<compile_context>
chip_gen: v7x
topology: tpu7x:2x2x1
jax: 0.10.0
libtpu: 0.0.40
codegen_flags: <defaults>
</compile_context>

<pallas_src>
import math

import jax
import jax.numpy as jnp
from jax.experimental import pallas as pl
from jax.experimental.pallas import tpu as pltpu


def _pair(v):
    if isinstance(v, (tuple, list)):
        assert len(v) == 2
        return int(v[0]), int(v[1])
    return int(v), int(v)


def _round_up(v, m):
    return (v + m - 1) // m * m


def _cdiv(a, b):
    return -(-a // b)


def _vmem_cap_bytes():
    """~75% of per-core VMEM (<= 48 MiB on v7x, ~96 MiB on v5e/v6e)."""
    try:
        return int(pltpu.get_tpu_info().vmem_capacity_bytes) * 3 // 4
    except Exception:
        return 48 * 1024 * 1024


def _phase_plan(in_size, out_size, k_len, stride, pad, dil):
    """Sub-pixel decomposition of a 1-D transposed conv.

    Output index j = r + q*stride (phase r).  The kernel taps contributing to
    phase r form an arithmetic sequence ks; tap m reads input index
    q + off_r + m*istep.  Returns (phases, max_n, maxQ, istep, left, right)
    where phases[r] = (ks, off_r) and left/right are the x paddings needed so
    every tap slice of length maxQ stays in bounds.
    """
    pad_t = dil * (k_len - 1) - pad          # implicit left pad of the stride-1 view
    maxQ = _cdiv(out_size, stride)
    istep = dil // math.gcd(dil, stride)
    phases = []
    for r in range(stride):
        ks = [k for k in range(k_len) if (k * dil + r - pad_t) % stride == 0]
        off = (r + ks[0] * dil - pad_t) // stride if ks else 0
        phases.append((ks, off))
    max_n = max(1, max(len(ks) for ks, _ in phases))
    lo = min(off for _, off in phases)
    hi = max(off for _, off in phases) + (max_n - 1) * istep + (maxQ - 1)
    left = max(0, -lo)
    right = max(0, hi - (in_size - 1))
    return phases, max_n, maxQ, istep, left, right


def _convt_add_kernel(cols_ref, w_ref, x2_ref, o_ref):
    # cols_ref: (CK_p, hw_tile)    bf16  im2col of one (batch, phase, hw-tile)
    # w_ref   : (C_out_p, CK_p)    bf16  per-phase flipped sub-kernel (flattened)
    # x2_ref  : (C_out_p, hw_tile) f32   residual with bias pre-folded
    # o_ref   : (C_out_p, hw_tile) f32
    o_ref[...] = (
        jnp.dot(w_ref[...], cols_ref[...], preferred_element_type=jnp.float32)
        + x2_ref[...]
    ).astype(o_ref.dtype)


def conv_transpose_add2d(x1, x2, weight, bias, *, stride=2, padding=1,
                         output_padding=0, dilation=1, hw_tile=2048):
    """out = ConvTranspose2d(x1; weight, bias, stride, padding, output_padding,
    dilation, groups=1) + x2.    NCHW in, float32 NCHW out."""
    f32, bf16 = jnp.float32, jnp.bfloat16

    B, C_in, H, W = x1.shape
    C_in_w, C_out, kh, kw = weight.shape
    assert C_in_w == C_in
    sh, sw = _pair(stride)
    ph_, pw_ = _pair(padding)
    oph, opw = _pair(output_padding)
    dh, dw = _pair(dilation)

    H_out = (H - 1) * sh - 2 * ph_ + dh * (kh - 1) + oph + 1
    W_out = (W - 1) * sw - 2 * pw_ + dw * (kw - 1) + opw + 1
    assert x2.shape == (B, C_out, H_out, W_out)

    # ---- sub-pixel (phase) decomposition plans for each spatial dim ----
    phases_h, n_h, Qh, istep_h, Lh, Rh = _phase_plan(H, H_out, kh, sh, ph_, dh)
    phases_w, n_w, Qw, istep_w, Lw, Rw = _phase_plan(W, W_out, kw, sw, pw_, dw)
    PH = sh * sw                      # number of output phases
    T = n_h * n_w                     # taps per phase (max over phases)
    CK = C_in * T                     # collapsed reduction size
    HWq = Qh * Qw                     # per-phase output positions

    # ---- padded sizes: CK / C_out only to bf16 sublane pack, HW to 128 lanes ----
    CK_p = _round_up(CK, 16)
    C_out_p = _round_up(C_out, 16)

    target = max(128, (int(hw_tile) // 128) * 128)
    chunks = _cdiv(HWq, 128)
    vmem_cap = _vmem_cap_bytes()
    budget = max(4 * 1024 * 1024, vmem_cap - 8 * 1024 * 1024)
    n_hw = max(1, _cdiv(chunks * 128, target))
    while True:
        tile_chunks = _cdiv(chunks, n_hw)
        hw_t = tile_chunks * 128
        block_bytes = (2 * CK_p * hw_t * 2          # cols  (bf16, double-buffered)
                       + 2 * C_out_p * CK_p * 2     # weight (bf16, double-buffered)
                       + 4 * C_out_p * hw_t * 4)    # residual + output (f32, 2 bufs each)
        if block_bytes <= budget or hw_t == 128:
            break
        n_hw += 1
    n_hw = _cdiv(chunks, tile_chunks)
    if B * PH * n_hw < 2 and chunks >= 2:           # keep >= 2 parallel steps (2-TC parts)
        tile_chunks = _cdiv(chunks, 2)
        hw_t = tile_chunks * 128
        n_hw = _cdiv(chunks, tile_chunks)
        block_bytes = (2 * CK_p * hw_t * 2 + 2 * C_out_p * CK_p * 2
                       + 4 * C_out_p * hw_t * 4)
    HWq_p = n_hw * hw_t

    # ---- im2col of the ORIGINAL x1 per phase (no zero-inserted upsample) ----
    x1p = jnp.pad(x1.astype(bf16), ((0, 0), (0, 0), (Lh, Rh), (Lw, Rw)))
    phase_cols = []
    for _, offh in phases_h:
        for _, offw in phases_w:
            taps = []
            for mh in range(n_h):
                r0 = Lh + offh + mh * istep_h
                for mw in range(n_w):
                    c0 = Lw + offw + mw * istep_w
                    taps.append(x1p[:, :, r0:r0 + Qh, c0:c0 + Qw])
            phase_cols.append(jnp.stack(taps, axis=2))        # (B, C_in, T, Qh, Qw)
    cols = jnp.stack(phase_cols, axis=1).reshape(B, PH, CK, HWq)
    if CK_p > CK or HWq_p > HWq:
        cols = jnp.pad(cols, ((0, 0), (0, 0), (0, CK_p - CK), (0, HWq_p - HWq)))

    # ---- per-phase flipped sub-kernels (tiny; zero rows for missing taps) ----
    w_flip = jnp.flip(weight.astype(f32), axis=(2, 3))        # (C_in, C_out, kh, kw)
    zero_tap = jnp.zeros((C_in, C_out), f32)
    phase_w = []
    for ksh, _ in phases_h:
        for ksw, _ in phases_w:
            taps = []
            for mh in range(n_h):
                for mw in range(n_w):
                    if mh < len(ksh) and mw < len(ksw):
                        taps.append(w_flip[:, :, ksh[mh], ksw[mw]])
                    else:
                        taps.append(zero_tap)
            wt = jnp.stack(taps, axis=0)                      # (T, C_in, C_out)
            wt = jnp.transpose(wt, (2, 1, 0)).reshape(C_out, CK)
            phase_w.append(wt)
    w2d = jnp.stack(phase_w, axis=0)                           # (PH, C_out, CK)
    w2d = jnp.pad(w2d, ((0, 0), (0, C_out_p - C_out), (0, CK_p - CK))).astype(bf16)

    # ---- residual (bias folded in) regrouped into phase layout ----
    x2b = x2.astype(f32) + bias.astype(f32)[None, :, None, None]
    pad_c, pad_h, pad_w = C_out_p - C_out, sh * Qh - H_out, sw * Qw - W_out
    if pad_c or pad_h or pad_w:
        x2b = jnp.pad(x2b, ((0, 0), (0, pad_c), (0, pad_h), (0, pad_w)))
    x2ph = x2b.reshape(B, C_out_p, Qh, sh, Qw, sw)
    x2ph = jnp.transpose(x2ph, (0, 3, 5, 1, 2, 4)).reshape(B, PH, C_out_p, HWq)
    if HWq_p > HWq:
        x2ph = jnp.pad(x2ph, ((0, 0), (0, 0), (0, 0), (0, HWq_p - HWq)))

    # ---- Pallas call: one small dot + residual add per (batch, phase, hw-tile) ----
    grid = (B, PH, n_hw)
    vmem_limit = int(min(max(2 * block_bytes, 32 * 1024 * 1024), vmem_cap))
    cost = pl.CostEstimate(
        flops=2 * B * PH * C_out_p * CK_p * HWq_p,
        transcendentals=0,
        bytes_accessed=int(cols.size * 2 + w2d.size * 2 + x2ph.size * 4
                           + B * PH * C_out_p * HWq_p * 4))

    out_ph = pl.pallas_call(
        _convt_add_kernel,
        out_shape=jax.ShapeDtypeStruct((B, PH, C_out_p, HWq_p), f32),
        grid=grid,
        in_specs=[
            pl.BlockSpec((None, None, CK_p, hw_t), lambda b, p, j: (b, p, 0, j)),
            pl.BlockSpec((None, C_out_p, CK_p), lambda b, p, j: (p, 0, 0)),
            pl.BlockSpec((None, None, C_out_p, hw_t), lambda b, p, j: (b, p, 0, j)),
        ],
        out_specs=pl.BlockSpec((None, None, C_out_p, hw_t),
                               lambda b, p, j: (b, p, 0, j)),
        compiler_params=pltpu.CompilerParams(
            dimension_semantics=("parallel", "parallel", "parallel"),
            vmem_limit_bytes=vmem_limit),
        cost_estimate=cost,
    )(cols, w2d, x2ph)

    # ---- interleave phase outputs back to NCHW and crop ----
    out = out_ph[:, :, :C_out, :HWq].reshape(B, sh, sw, C_out, Qh, Qw)
    out = jnp.transpose(out, (0, 3, 4, 1, 5, 2)).reshape(B, C_out, sh * Qh, sw * Qw)
    return out[:, :, :H_out, :W_out]


if __name__ == "__main__":
    import functools

    def reference(x1, x2, weight, bias, stride, padding, output_padding, dilation):
        sh, sw = _pair(stride)
        ph_, pw_ = _pair(padding)
        oph, opw = _pair(output_padding)
        dh, dw = _pair(dilation)
        kh, kw = weight.shape[2], weight.shape[3]
        w_oihw = jnp.transpose(jnp.flip(weight, axis=(2, 3)), (1, 0, 2, 3))
        out = jax.lax.conv_general_dilated(
            x1, w_oihw, window_strides=(1, 1),
            padding=((dh * (kh - 1) - ph_, dh * (kh - 1) - ph_ + oph),
                     (dw * (kw - 1) - pw_, dw * (kw - 1) - pw_ + opw)),
            lhs_dilation=(sh, sw), rhs_dilation=(dh, dw),
            dimension_numbers=("NCHW", "OIHW", "NCHW"),
            precision=jax.lax.Precision.HIGHEST)
        return out + bias[None, :, None, None] + x2

    def run_case(key, B, C_in, C_out, H, W, kh, kw, stride, padding,
                 output_padding=0, dilation=1):
        sh, sw = _pair(stride)
        ph_, pw_ = _pair(padding)
        oph, opw = _pair(output_padding)
        dh, dw = _pair(dilation)
        H_out = (H - 1) * sh - 2 * ph_ + dh * (kh - 1) + oph + 1
        W_out = (W - 1) * sw - 2 * pw_ + dw * (kw - 1) + opw + 1
        k1, k2, k3, k4 = jax.random.split(key, 4)
        x1 = jax.random.normal(k1, (B, C_in, H, W), jnp.float32)
        x2 = jax.random.normal(k2, (B, C_out, H_out, W_out), jnp.float32)
        # PyTorch ConvTranspose2d parameter shapes: weight (C_in, C_out, kh, kw), bias (C_out,)
        weight = 0.1 * jax.random.normal(k3, (C_in, C_out, kh, kw), jnp.float32)
        bias = 0.1 * jax.random.normal(k4, (C_out,), jnp.float32)
        fn = jax.jit(functools.partial(
            conv_transpose_add2d, stride=stride, padding=padding,
            output_padding=output_padding, dilation=dilation))
        out = jax.block_until_ready(fn(x1, x2, weight, bias))
        ref = jax.block_until_ready(
            reference(x1, x2, weight, bias, stride, padding, output_padding, dilation))
        assert out.shape == ref.shape, (out.shape, ref.shape)
        err = float(jnp.max(jnp.abs(out - ref)))
        # bf16 matmul inputs with f32 accumulation -> relaxed tolerance.
        assert err < 3e-2, err
        return err

    key = jax.random.PRNGKey(0)
    k_a, k_b = jax.random.split(key)
    # Typical 2x-upsampling ConvTranspose2d (k=4, s=2, p=1) + residual add.
    run_case(k_a, B=2, C_in=4, C_out=8, H=16, W=16, kh=4, kw=4, stride=2, padding=1)
    # Ragged case: odd output size / uneven per-phase tap counts (k=3, s=2, p=1).
    run_case(k_b, B=1, C_in=3, C_out=6, H=7, W=7, kh=3, kw=3, stride=2, padding=1)
    print("KERNEL_OK")
</pallas_src>

<mosaic_0001>
module attributes {stable_mosaic.version = 11 : i64} {
  func.func @_convt_add_kernel(%arg0: i32, %arg1: i32, %arg2: i32, %arg3: memref<1x1x16x256xbf16, #tpu.memory_space<vmem>>, %arg4: memref<1x16x16xbf16, #tpu.memory_space<vmem>>, %arg5: memref<1x1x16x256xf32, #tpu.memory_space<vmem>>, %arg6: memref<1x1x16x256xf32, #tpu.memory_space<vmem>>) attributes {dimension_semantics = [#tpu.dimension_semantics<parallel>, #tpu.dimension_semantics<parallel>, #tpu.dimension_semantics<parallel>], iteration_bounds = array<i64: 2, 4, 1>, scalar_prefetch = 0 : i64, scratch_operands = 0 : i64, tpu.core_type = #tpu.core_type<tc>, window_params = [{transform_indices = @transform_0, window_bounds = array<i64: 1, 1, 16, 256>}, {transform_indices = @transform_1, window_bounds = array<i64: 1, 16, 16>}, {transform_indices = @transform_2, window_bounds = array<i64: 1, 1, 16, 256>}, {transform_indices = @transform_3, window_bounds = array<i64: 1, 1, 16, 256>}]} {
    %c0 = arith.constant 0 : index
    %c0_0 = arith.constant 0 : index
    %c0_1 = arith.constant 0 : index
    %0 = vector.load %arg4[%c0, %c0_0, %c0_1] : memref<1x16x16xbf16, #tpu.memory_space<vmem>>, vector<1x16x16xbf16>
    %1 = vector.shape_cast %0 : vector<1x16x16xbf16> to vector<16x16xbf16>
    %c0_2 = arith.constant 0 : index
    %c0_3 = arith.constant 0 : index
    %c0_4 = arith.constant 0 : index
    %c0_5 = arith.constant 0 : index
    %2 = vector.load %arg3[%c0_2, %c0_3, %c0_4, %c0_5] : memref<1x1x16x256xbf16, #tpu.memory_space<vmem>>, vector<1x1x16x256xbf16>
    %3 = vector.shape_cast %2 : vector<1x1x16x256xbf16> to vector<16x256xbf16>
    %cst = arith.constant dense<0.000000e+00> : vector<16x256xf32>
    %4 = tpu.matmul %1, %3, %cst {dimension_numbers = #tpu.dot_dimension_numbers<[1], [0], [0], [1], [0, 0, 1, 1], [], []>} : vector<16x16xbf16>, vector<16x256xbf16>, vector<16x256xf32> -> vector<16x256xf32>
    %c0_6 = arith.constant 0 : index
    %c0_7 = arith.constant 0 : index
    %c0_8 = arith.constant 0 : index
    %c0_9 = arith.constant 0 : index
    %5 = vector.load %arg5[%c0_6, %c0_7, %c0_8, %c0_9] : memref<1x1x16x256xf32, #tpu.memory_space<vmem>>, vector<1x1x16x256xf32>
    %6 = vector.shape_cast %5 : vector<1x1x16x256xf32> to vector<16x256xf32>
    %7 = arith.addf %4, %6 : vector<16x256xf32>
    %c0_10 = arith.constant 0 : index
    %c0_11 = arith.constant 0 : index
    %c0_12 = arith.constant 0 : index
    %c0_13 = arith.constant 0 : index
    %8 = vector.load %arg6[%c0_10, %c0_11, %c0_12, %c0_13] : memref<1x1x16x256xf32, #tpu.memory_space<vmem>>, vector<1x1x16x256xf32>
    %9 = vector.shape_cast %8 : vector<1x1x16x256xf32> to vector<16x256xf32>
    %10 = vector.shape_cast %7 : vector<16x256xf32> to vector<1x1x16x256xf32>
    tpu.vector_store %arg6[%c0_10, %c0_11, %c0_12, %c0_13], %10 {strides = array<i32>} : memref<1x1x16x256xf32, #tpu.memory_space<vmem>>, vector<1x1x16x256xf32>,
    return
  }
  func.func @transform_0(%arg0: i32, %arg1: i32, %arg2: i32) -> (i32, i32, i32, i32) {
    %c0_i32 = arith.constant 0 : i32
    %c0_i32_0 = arith.constant 0 : i32
    return %arg0, %arg1, %c0_i32, %arg2 : i32, i32, i32, i32
  }
  func.func @transform_1(%arg0: i32, %arg1: i32, %arg2: i32) -> (i32, i32, i32) {
    %c0_i32 = arith.constant 0 : i32
    %c0_i32_0 = arith.constant 0 : i32
    %c0_i32_1 = arith.constant 0 : i32
    return %arg1, %c0_i32, %c0_i32_0 : i32, i32, i32
  }
  func.func @transform_2(%arg0: i32, %arg1: i32, %arg2: i32) -> (i32, i32, i32, i32) {
    %c0_i32 = arith.constant 0 : i32
    %c0_i32_0 = arith.constant 0 : i32
    return %arg0, %arg1, %c0_i32, %arg2 : i32, i32, i32, i32
  }
  func.func @transform_3(%arg0: i32, %arg1: i32, %arg2: i32) -> (i32, i32, i32, i32) {
    %c0_i32 = arith.constant 0 : i32
    %c0_i32_0 = arith.constant 0 : i32
    return %arg0, %arg1, %c0_i32, %arg2 : i32, i32, i32, i32
  }
}

</mosaic_0001>

<bundles_post_ra>
// kernel: conv_transpose_add2d.1
= control target key start
LH: loop header
LB: loop body
LE: loop exit
PB: predicated region body
PF: predicated region fallthrough
CT: control target
= control target key end

     0   :  { %s666_s12 = smov 0   ;;  %s668_s13 = smov 0   ;;  %s723_s0 = inlined_call_operand.vmem [shape: bf16[2,4,16,256], index: 0, kind: input, shape index: {}]   ;;  %s724_s1 = inlined_call_operand.vmem [shape: bf16[4,16,16], index: 1, kind: input, shape index: {}]   ;;  %s725_s2 = inlined_call_operand.vmem [shape: f32[2,4,16,256], index: 2, kind: input, shape index: {}]   ;;  %s726_s3 = inlined_call_operand.vmem [shape: f32[2,4,16,256], index: 3, kind: output, shape index: {}]  }
   0x1   :  { %s670_s14 = smov 0   ;;  %s672_s15 = smov 0  }
   0x2   :  { %s674_s16 = smov 0  }
   0x3 LB: > { %s28_s17 = sadd.s32 1, %s635_s14  ;;  %s32_s18 = sadd.s32 1, %s639_s15  ;;  %s643_s16 = sphi %s674_s16, %s13_s16   ;;  %s639_s15 = sphi %s672_s15, %s730_s15   ;;  %s635_s14 = sphi %s670_s14, %s729_s14   ;;  %s631_s13 = sphi %s668_s13, %s728_s13   ;;  %s627_s12 = sphi %s666_s12, %s727_s12  }
   0x4   : > { %p30_p0 = scmp.ge.s32.totalorder %s28_s17, 4  ;;  %p541_p1 = scmp.ge.s32.totalorder %s643_s16, 1 }
   0x5   : > { %p206_p2 = scmp.lt.s32.totalorder %s643_s16, 9 }
   0x6   : > { %s732_s17 = smov (%p30_p0, %s28_s17), 0  ;;  %s734_s18 = smov (!%p30_p0, %s32_s18), %s639_s15 }
   0x7   : > { %p207_p3 = pnand %p541_p1, %p206_p2  ;;  %p34_p4 = scmp.ge.s32.totalorder %s734_s18, 2 }
   0x8   : > { %p265_p5 = scmp.lt.s32.totalorder (!%p207_p3), %s631_s13, 1  ;;  %p267_p6 = scmp.lt.s32.totalorder (!%p207_p3), %s627_s12, 3  ;;  %v645_v0 = vmov (!%p207_p3), 0   ;;  %vm335_vm0 = vcmask (!%p207_p3), 130048  }
   0x9   : > { %s736_s18 = smov (%p34_p4, %s734_s18), 0  ;;  %210 = sbr.rel (%p207_p3) target bundleno = 244 (0xf4), region = 32 }
   0xa   : > { %371 = vmatprep.mubr.bf16.mxu0 (!%p207_p3), %v645_v0 }
  0x10   : > { %s738_s13 = smov (!%p265_p5, %s631_s13), 1  ;;  %s740_s12 = smov (!%p267_p6, %s627_s12), 3 }
  0x11   : > { %s543_s19 = sshll.u32 %s738_s13, 4  ;;  %s542_s20 = sshll.u32 %s740_s12, 2 }
  0x12   : > { %s559_s21 = sshll.u32 %s740_s12, 3  ;;  %s274_s22 = sadd.s32 %s543_s19, %s542_s20 }
  0x13   : > { %s282_s25 = scalar_lea.vmem %s724_s1, %s559_s21  ;;  %s544_s26 = sshll.u32 %s274_s22, 2 }
  0x14   : > { %s276_s29 = scalar_lea.vmem %s723_s0, %s544_s26  ;;  %v604_v3 = vld [vmem:[%s282_s25] sm:$0xff]   ;;  %s549_s30 = sshll.u32 %s274_s22, 3 }
  0x15   : > { %v601_v1 = vld [vmem:[%s276_s29 + $0x4] ss:$8 sps:$4 sm:$0xff]   ;;  %v603_v2 = vld [vmem:[%s276_s29] ss:$8 sps:$4 sm:$0xff]   ;;  %s295_s6 = scalar_lea.vmem %s725_s2, %s549_s30  ;;  %s309_s9 = scalar_lea.vmem %s726_s3, %s549_s30 }
  0x16   : > { %339 = vmatprep.subr.bf16.mxu0 %v601_v1  ;;  %v316_v4 = vld [vmem:[%s295_s6] sm:$0xff]  ;;  %v317_v5 = vld [vmem:[%s295_s6 + $0x8] sm:$0xff]  ;;  %v318_v7 = vld [vmem:[%s295_s6 + $0x10] sm:$0xff] }
  0x17   : > { %340 = vmatpush1.bf16.msra.mxu0 %v603_v2  ;;  %v319_v10 = vld [vmem:[%s295_s6 + $0x18] sm:$0xff] }
  0x1a   : > { %556 = vmatmul.mubr.msk.bf16.vlgmr.msra.gmra.mrb[0].mxu0 %vm335_vm0, %v604_v3 }
  0xed   : > { %v373_v6 = vpop.f32.mrb[0].mxu0 }
  0xee   : > { %v374_v8 = vadd.f32 %v373_v6, %v316_v4  ;;  %v375_v9 = vpop.f32.mrb[1].mxu0 }
  0xef   : > { %v376_v11 = vadd.f32 %v375_v9, %v317_v5  ;;  %v377_v12 = vpop.f32.mrb[2].mxu0 }
  0xf0   : > { %382 = vst [vmem:[%s309_s9] sm:$0xff] %v374_v8  ;;  %v378_v13 = vadd.f32 %v377_v12, %v318_v7  ;;  %v379_v14 = vpop.f32.mrb[3].mxu0 }
  0xf1   : > { %383 = vst [vmem:[%s309_s9 + $0x8] sm:$0xff] %v376_v11  ;;  %v380_v15 = vadd.f32 %v379_v14, %v319_v10 }
  0xf2   : > { %384 = vst [vmem:[%s309_s9 + $0x10] sm:$0xff] %v378_v13 }
  0xf3   : > { %385 = vst [vmem:[%s309_s9 + $0x18] sm:$0xff] %v380_v15 }
  0xf4 PF: > { %s13_s16 = sadd.s32 1, %s643_s16   ;;  %s727_s12 = smov %s635_s14 }
  0xf5   : > { %p10_p7 = scmp.ge.s32.totalorder %s13_s16, 10   ;;  %s728_s13 = smov %s639_s15 }
  0xf6   : > { %s729_s14 = smov %s732_s17  ;;  %s730_s15 = smov %s736_s18 }
  0xf7   :  { %12 = sbr.rel (!%p10_p7) target bundleno = 3 (0x3), region = 68 }

</bundles_post_ra>
